<compile_context>
chip_gen: v7x
topology: tpu7x:2x2x1
jax: 0.10.0
libtpu: 0.0.40
codegen_flags: <defaults>
</compile_context>

<pallas_src>
import jax
import jax.numpy as jnp
from jax import lax
from jax.experimental import pallas as pl
from jax.experimental.pallas import tpu as pltpu


def _round_up(x, m):
    return (x + m - 1) // m * m


# dot_general dimension numbers for  A @ B^T  (contract last dim of both).
_TRANS_B_DIMS = (((1,), (1,)), ((), ()))


def _mlp_kernel(x_ref, w1_ref, b1_ref, w2_ref, b2_ref, w3_ref, o_ref):
    """One batch tile of the RegressorMLP forward (eval mode).

    x_ref : (TB, F)   activations for this batch tile (f32 in HBM/VMEM)
    w1_ref: (F,  F)   bf16 fc1 weight with BN1 scale folded in ([in, out])
    b1_ref: (1,  F)   f32  fc1 bias + BN1 shift (folded)
    w2_ref: (F,  Hp)  bf16 fc2 weight with BN2 scale folded, zero-padded to Hp
    b2_ref: (1,  Hp)  f32  fc2 bias + BN2 shift (folded, zero-padded)
    w3_ref: (1,  Hp)  bf16 fc3 weight as a lane-dense row (zero-padded)
    o_ref : (1,  TB)  f32  output with batch on the lane axis (lane-dense store)
    """
    # In-kernel bf16 cast of the activations: cheap VPU op, keeps x's HBM
    # traffic to a single f32 read (no wrapper-side cast round-trip), and puts
    # bf16 operands on the MXU (f32 operands cost ~3x the matmul passes).
    x = x_ref[...].astype(jnp.bfloat16)

    # fc1 (+ folded BN1) + ReLU   -- f32 accumulation on the MXU.
    h1 = jnp.dot(x, w1_ref[...], preferred_element_type=jnp.float32)
    h1 = jnp.maximum(h1 + b1_ref[...], 0.0).astype(jnp.bfloat16)
    # Dropout2d: identity in eval mode.

    # fc2 (+ folded BN2) + ReLU
    h2 = jnp.dot(h1, w2_ref[...], preferred_element_type=jnp.float32)
    h2 = jnp.maximum(h2 + b2_ref[...], 0.0).astype(jnp.bfloat16)

    # fc3: (1, Hp) @ (TB, Hp)^T -> (1, TB).  Transposed-RHS contraction on the
    # last (lane) dim of both operands -- same pattern as q @ k^T in flash
    # attention; lowers directly on the MXU, no XLU transpose of h2, and the
    # output store is lane-dense (batch on the lane axis).  The scalar fc3
    # bias is added in the wrapper.
    o_ref[...] = lax.dot_general(
        w3_ref[...], h2, _TRANS_B_DIMS,
        preferred_element_type=jnp.float32).astype(o_ref.dtype)


def prepare_params(params, *, eps=1e-5, pad_hidden_to=128):
    """Fold eval-mode BatchNorm into the linears and cast weights to bf16.

    Done once at parameter-prep time, not per call.  Fold math is in f32; only
    the final weight matrices are cast to bf16 (biases stay f32).
    """
    F = params["w1"].shape[0]
    H = params["w2"].shape[1]
    Hp = _round_up(H, pad_hidden_to)

    s1 = params["bn1_gamma"] * lax.rsqrt(params["bn1_var"] + eps)
    t1 = params["bn1_beta"] - params["bn1_mean"] * s1
    s2 = params["bn2_gamma"] * lax.rsqrt(params["bn2_var"] + eps)
    t2 = params["bn2_beta"] - params["bn2_mean"] * s2

    w1 = params["w1"] * s1[None, :]                     # (F, F)
    b1 = (params["b1"] * s1 + t1).reshape(1, F)         # (1, F)

    w2 = params["w2"] * s2[None, :]                     # (F, H)
    b2 = (params["b2"] * s2 + t2).reshape(1, H)         # (1, H)
    # Zero-pad hidden dim: padded features are relu(0) = 0 and carry zero fc3
    # weight, so the output is unchanged, but tiles become lane-aligned.
    w2 = jnp.pad(w2, ((0, 0), (0, Hp - H)))             # (F, Hp)
    b2 = jnp.pad(b2, ((0, 0), (0, Hp - H)))             # (1, Hp)

    w3 = jnp.pad(params["w3"][:, 0].reshape(1, H),
                 ((0, 0), (0, Hp - H)))                 # (1, Hp) lane-dense row
    b3 = params["b3"].reshape(1, 1)                     # scalar, added post-kernel

    return dict(
        w1=w1.astype(jnp.bfloat16), b1=b1,
        w2=w2.astype(jnp.bfloat16), b2=b2,
        w3=w3.astype(jnp.bfloat16), b3=b3,
    )


@jax.jit
def regressor_mlp_forward(x, prepped):
    """x: [B, F] float32 -> [B, 1] float32 (eval-mode forward)."""
    B, F = x.shape
    Hp = prepped["w2"].shape[1]

    # Batch tile: multiple of 128 (lane-dense (1, TB) output store), capped at
    # 2048 to amortize the ~0.35 us/step grid overhead (VMEM stays small: the
    # x double-buffer is 2*TB*F*4 B and the f32 h1/h2 staging ~TB*(F+Hp)*4 B,
    # ~1.5 MiB total at F=32, TB=2048).  TB is also chosen so the grid has
    # >= 2 steps whenever the batch allows it, so "parallel" can shard steps
    # across v7x's two TensorCores (no-op on single-TC v5e/v6e).
    MAX_TB = 2048
    n128 = pl.cdiv(B, 128)
    TB = 128 * max(1, min(MAX_TB // 128, pl.cdiv(n128, 2)))
    grid = pl.cdiv(B, TB)

    if B < TB:
        # Tiny batch: padding costs < TB*F*4 bytes, negligible; keeps the
        # single block fully in bounds.
        x_in = jnp.pad(x, ((0, TB - B), (0, 0)))
    else:
        # Real batch: NO full-HBM rewrite of x.  The last grid block may be
        # partial; Pallas masks the out-of-bounds rows (contents unspecified).
        # Invariant this relies on: rows never mix anywhere in the forward
        # (all matmuls contract over features, never over batch), so garbage
        # tail rows only produce garbage output lanes >= B, sliced off below.
        # Do NOT add any reduction over the batch axis inside the kernel
        # without restoring the pad.
        x_in = x

    const = lambda shape: pl.BlockSpec(shape, lambda i: (0, 0))

    out = pl.pallas_call(
        _mlp_kernel,
        out_shape=jax.ShapeDtypeStruct((1, grid * TB), jnp.float32),
        grid=(grid,),
        in_specs=[
            pl.BlockSpec((TB, F), lambda i: (i, 0)),   # x, tiled over batch
            const((F, F)),  const((1, F)),             # fc1 (+BN1), VMEM-resident
            const((F, Hp)), const((1, Hp)),            # fc2 (+BN2), VMEM-resident
            const((1, Hp)),                            # fc3 row,    VMEM-resident
        ],
        out_specs=pl.BlockSpec((1, TB), lambda i: (0, i)),
        compiler_params=pltpu.CompilerParams(
            dimension_semantics=("parallel",)),        # shard batch across TCs
    )(x_in, prepped["w1"], prepped["b1"],
      prepped["w2"], prepped["b2"], prepped["w3"])

    # fc3 bias: scalar add in the wrapper; drop batch padding; back to (B, 1).
    return out[0, :B].reshape(B, 1) + prepped["b3"]


def init_params(key, out_feature_size):
    """Init mirroring PyTorch defaults, with non-trivial BN running stats."""
    F, H = out_feature_size, 50
    keys = jax.random.split(key, 14)

    def linear_init(kw, kb, fan_in, fan_out):
        bound = 1.0 / jnp.sqrt(fan_in)
        # stored as [in, out] so the kernel does x @ W
        w = jax.random.uniform(kw, (fan_in, fan_out), jnp.float32, -bound, bound)
        b = jax.random.uniform(kb, (fan_out,), jnp.float32, -bound, bound)
        return w, b

    w1, b1 = linear_init(keys[0], keys[1], F, F)
    w2, b2 = linear_init(keys[2], keys[3], F, H)
    w3, b3 = linear_init(keys[4], keys[5], H, 1)

    return dict(
        w1=w1, b1=b1,
        bn1_gamma=jax.random.uniform(keys[6], (F,), jnp.float32, 0.5, 1.5),
        bn1_beta=jax.random.normal(keys[7], (F,), jnp.float32) * 0.1,
        bn1_mean=jax.random.normal(keys[8], (F,), jnp.float32) * 0.1,
        bn1_var=jax.random.uniform(keys[9], (F,), jnp.float32, 0.5, 1.5),
        w2=w2, b2=b2,
        bn2_gamma=jax.random.uniform(keys[10], (H,), jnp.float32, 0.5, 1.5),
        bn2_beta=jax.random.normal(keys[11], (H,), jnp.float32) * 0.1,
        bn2_mean=jax.random.normal(keys[12], (H,), jnp.float32) * 0.1,
        bn2_var=jax.random.uniform(keys[13], (H,), jnp.float32, 0.5, 1.5),
        w3=w3, b3=b3,
    )


def _reference(x, params):
    """Pure-JAX f32 reference (PyTorch eval-mode semantics) for correctness."""
    eps = 1e-5
    h = x @ params["w1"] + params["b1"]
    h = (h - params["bn1_mean"]) / jnp.sqrt(params["bn1_var"] + eps) \
        * params["bn1_gamma"] + params["bn1_beta"]
    h = jnp.maximum(h, 0.0)
    h = h @ params["w2"] + params["b2"]
    h = (h - params["bn2_mean"]) / jnp.sqrt(params["bn2_var"] + eps) \
        * params["bn2_gamma"] + params["bn2_beta"]
    h = jnp.maximum(h, 0.0)
    return h @ params["w3"] + params["b3"]


if __name__ == "__main__":
    key = jax.random.PRNGKey(0)
    k_param, k_x = jax.random.split(key)

    OUT_FEATURE_SIZE = 32   # hidden / input feature width
    BATCH = 8

    params = init_params(k_param, OUT_FEATURE_SIZE)
    prepped = prepare_params(params)   # BN fold + bf16 cast + padding: once
    x = jax.random.normal(k_x, (BATCH, OUT_FEATURE_SIZE), jnp.float32)

    y = regressor_mlp_forward(x, prepped)
    y = jax.block_until_ready(y)

    y_ref = _reference(x, params)
    assert y.shape == (BATCH, 1), y.shape
    # bf16 weights/activations (f32 accumulation) vs the f32 reference:
    # tolerance relaxed from 1e-4 accordingly.
    assert jnp.allclose(y, y_ref, atol=5e-2, rtol=5e-2), \
        f"max abs err {jnp.max(jnp.abs(y - y_ref))}"

    print("KERNEL_OK")
</pallas_src>

<mosaic_0001>
module attributes {stable_mosaic.version = 11 : i64} {
  func.func @_mlp_kernel(%arg0: i32, %arg1: memref<128x32xf32, #tpu.memory_space<vmem>>, %arg2: memref<32x32xbf16, #tpu.memory_space<vmem>>, %arg3: memref<1x32xf32, #tpu.memory_space<vmem>>, %arg4: memref<32x128xbf16, #tpu.memory_space<vmem>>, %arg5: memref<1x128xf32, #tpu.memory_space<vmem>>, %arg6: memref<1x128xbf16, #tpu.memory_space<vmem>>, %arg7: memref<1x128xf32, #tpu.memory_space<vmem>>) attributes {dimension_semantics = [#tpu.dimension_semantics<parallel>], iteration_bounds = array<i64: 1>, scalar_prefetch = 0 : i64, scratch_operands = 0 : i64, tpu.core_type = #tpu.core_type<tc>, window_params = [{transform_indices = @transform_0, window_bounds = array<i64: 128, 32>}, {pipeline_mode = #tpu.pipeline_mode<synchronous>, transform_indices = @transform_1, window_bounds = array<i64: 32, 32>}, {pipeline_mode = #tpu.pipeline_mode<synchronous>, transform_indices = @transform_2, window_bounds = array<i64: 1, 32>}, {pipeline_mode = #tpu.pipeline_mode<synchronous>, transform_indices = @transform_3, window_bounds = array<i64: 32, 128>}, {pipeline_mode = #tpu.pipeline_mode<synchronous>, transform_indices = @transform_4, window_bounds = array<i64: 1, 128>}, {pipeline_mode = #tpu.pipeline_mode<synchronous>, transform_indices = @transform_5, window_bounds = array<i64: 1, 128>}, {transform_indices = @transform_6, window_bounds = array<i64: 1, 128>}]} {
    %c0 = arith.constant 0 : index
    %c0_0 = arith.constant 0 : index
    %0 = vector.load %arg1[%c0, %c0_0] : memref<128x32xf32, #tpu.memory_space<vmem>>, vector<128x32xf32>
    %1 = arith.truncf %0 : vector<128x32xf32> to vector<128x32xbf16>
    %c0_1 = arith.constant 0 : index
    %c0_2 = arith.constant 0 : index
    %2 = vector.load %arg2[%c0_1, %c0_2] : memref<32x32xbf16, #tpu.memory_space<vmem>>, vector<32x32xbf16>
    %cst = arith.constant dense<0.000000e+00> : vector<128x32xf32>
    %3 = tpu.matmul %1, %2, %cst {dimension_numbers = #tpu.dot_dimension_numbers<[1], [0], [0], [1], [0, 0, 1, 1], [], []>} : vector<128x32xbf16>, vector<32x32xbf16>, vector<128x32xf32> -> vector<128x32xf32>
    %c0_3 = arith.constant 0 : index
    %c0_4 = arith.constant 0 : index
    %4 = vector.load %arg3[%c0_3, %c0_4] : memref<1x32xf32, #tpu.memory_space<vmem>>, vector<1x32xf32>
    %5 = vector.broadcast %4 : vector<1x32xf32> to vector<128x32xf32>
    %6 = arith.addf %3, %5 : vector<128x32xf32>
    %cst_5 = arith.constant 0.000000e+00 : f32
    %7 = vector.broadcast %cst_5 : f32 to vector<128x32xf32>
    %8 = arith.maximumf %6, %7 : vector<128x32xf32>
    %9 = arith.truncf %8 : vector<128x32xf32> to vector<128x32xbf16>
    %c0_6 = arith.constant 0 : index
    %c0_7 = arith.constant 0 : index
    %10 = vector.load %arg4[%c0_6, %c0_7] : memref<32x128xbf16, #tpu.memory_space<vmem>>, vector<32x128xbf16>
    %cst_8 = arith.constant dense<0.000000e+00> : vector<128x128xf32>
    %11 = tpu.matmul %9, %10, %cst_8 {dimension_numbers = #tpu.dot_dimension_numbers<[1], [0], [0], [1], [0, 0, 1, 1], [], []>} : vector<128x32xbf16>, vector<32x128xbf16>, vector<128x128xf32> -> vector<128x128xf32>
    %c0_9 = arith.constant 0 : index
    %c0_10 = arith.constant 0 : index
    %12 = vector.load %arg5[%c0_9, %c0_10] : memref<1x128xf32, #tpu.memory_space<vmem>>, vector<1x128xf32>
    %13 = vector.broadcast %12 : vector<1x128xf32> to vector<128x128xf32>
    %14 = arith.addf %11, %13 : vector<128x128xf32>
    %cst_11 = arith.constant 0.000000e+00 : f32
    %15 = vector.broadcast %cst_11 : f32 to vector<128x128xf32>
    %16 = arith.maximumf %14, %15 : vector<128x128xf32>
    %17 = arith.truncf %16 : vector<128x128xf32> to vector<128x128xbf16>
    %c0_12 = arith.constant 0 : index
    %c0_13 = arith.constant 0 : index
    %18 = vector.load %arg6[%c0_12, %c0_13] : memref<1x128xbf16, #tpu.memory_space<vmem>>, vector<1x128xbf16>
    %cst_14 = arith.constant dense<0.000000e+00> : vector<1x128xf32>
    %19 = tpu.matmul %18, %17, %cst_14 {dimension_numbers = #tpu.dot_dimension_numbers<[1], [1], [0], [0], [0, 0, 1, 0], [], []>} : vector<1x128xbf16>, vector<128x128xbf16>, vector<1x128xf32> -> vector<1x128xf32>
    %c0_15 = arith.constant 0 : index
    %c0_16 = arith.constant 0 : index
    %20 = vector.load %arg7[%c0_15, %c0_16] : memref<1x128xf32, #tpu.memory_space<vmem>>, vector<1x128xf32>
    tpu.vector_store %arg7[%c0_15, %c0_16], %19 {strides = array<i32>} : memref<1x128xf32, #tpu.memory_space<vmem>>, vector<1x128xf32>,
    return
  }
  func.func @transform_0(%arg0: i32) -> (i32, i32) {
    %c0_i32 = arith.constant 0 : i32
    %c0_i32_0 = arith.constant 0 : i32
    return %arg0, %c0_i32 : i32, i32
  }
  func.func @transform_1(%arg0: i32) -> (i32, i32) {
    %c0_i32 = arith.constant 0 : i32
    %c0_i32_0 = arith.constant 0 : i32
    %c0_i32_1 = arith.constant 0 : i32
    return %c0_i32, %c0_i32_0 : i32, i32
  }
  func.func @transform_2(%arg0: i32) -> (i32, i32) {
    %c0_i32 = arith.constant 0 : i32
    %c0_i32_0 = arith.constant 0 : i32
    %c0_i32_1 = arith.constant 0 : i32
    return %c0_i32, %c0_i32_0 : i32, i32
  }
  func.func @transform_3(%arg0: i32) -> (i32, i32) {
    %c0_i32 = arith.constant 0 : i32
    %c0_i32_0 = arith.constant 0 : i32
    %c0_i32_1 = arith.constant 0 : i32
    return %c0_i32, %c0_i32_0 : i32, i32
  }
  func.func @transform_4(%arg0: i32) -> (i32, i32) {
    %c0_i32 = arith.constant 0 : i32
    %c0_i32_0 = arith.constant 0 : i32
    %c0_i32_1 = arith.constant 0 : i32
    return %c0_i32, %c0_i32_0 : i32, i32
  }
  func.func @transform_5(%arg0: i32) -> (i32, i32) {
    %c0_i32 = arith.constant 0 : i32
    %c0_i32_0 = arith.constant 0 : i32
    %c0_i32_1 = arith.constant 0 : i32
    return %c0_i32, %c0_i32_0 : i32, i32
  }
  func.func @transform_6(%arg0: i32) -> (i32, i32) {
    %c0_i32 = arith.constant 0 : i32
    %c0_i32_0 = arith.constant 0 : i32
    return %c0_i32, %arg0 : i32, i32
  }
}

</mosaic_0001>

<bundles_post_ra>
// kernel: regressor_mlp_forward.1
= control target key start
LH: loop header
LB: loop body
LE: loop exit
PB: predicated region body
PF: predicated region fallthrough
CT: control target
= control target key end

     0   :  { %vm71_vm0 = vcmask 261120   ;;  %vm549_vm1 = vmmov 0   ;;  %s682_s1 = inlined_call_operand.vmem [shape: bf16[32,32], index: 1, kind: input, shape index: {}]   ;;  %s683_s0 = inlined_call_operand.vmem [shape: f32[128,32], index: 0, kind: input, shape index: {}]   ;;  %s684_s3 = inlined_call_operand.vmem [shape: bf16[32,128], index: 3, kind: input, shape index: {}]   ;;  %s685_s2 = inlined_call_operand.vmem [shape: f32[1,32], index: 2, kind: input, shape index: {}]   ;;  %s686_s4 = inlined_call_operand.vmem [shape: f32[1,128], index: 4, kind: input, shape index: {}]   ;;  %s687_s5 = inlined_call_operand.vmem [shape: bf16[1,128], index: 5, kind: input, shape index: {}]   ;;  %s688_s6 = inlined_call_operand.vmem [shape: f32[1,128], index: 6, kind: output, shape index: {}]  }
   0x1   :  { %v544_v0 = vld [vmem:[%s682_s1] sm:$0xff]   ;;  %v545_v1 = vld [vmem:[%s682_s1 + $0x8] sm:$0xff]   ;;  %v26_v5 = vld [vmem:[%s683_s0 + $0x10] sm:$0xff] }
   0x2   :  { %482 = vmatprep.subr.bf16.mxu1 %v544_v0  ;;  %v24_v2 = vld [vmem:[%s683_s0] sm:$0xff]  ;;  %v25_v3 = vld [vmem:[%s683_s0 + $0x8] sm:$0xff]  ;;  %v27_v6 = vld [vmem:[%s683_s0 + $0x18] sm:$0xff] }
   0x3   :  { %483 = vmatpush3.bf16.msra.mxu1 %v544_v0  ;;  %v40_v4 = vpack.c.bf16 %v25_v3, %v24_v2  ;;  %v28_v7 = vld [vmem:[%s683_s0 + $0x20] sm:$0xff]  ;;  %v29_v8 = vld [vmem:[%s683_s0 + $0x28] sm:$0xff]  ;;  %v41_v9 = vpack.c.bf16 %v27_v6, %v26_v5  ;;  %v30_v13 = vld [vmem:[%s683_s0 + $0x30] sm:$0xff] }
   0x4   :  { %484 = vmatprep.subr.bf16.mxu1 %v545_v1  ;;  %v42_v10 = vpack.c.bf16 %v29_v8, %v28_v7  ;;  %v546_v11 = vld [vmem:[%s684_s3] sm:$0xff]   ;;  %v547_v12 = vld [vmem:[%s684_s3 + $0x8] sm:$0xff]   ;;  %v31_v14 = vld [vmem:[%s683_s0 + $0x38] sm:$0xff] }
   0x5   :  { %486 = vmatprep.mubr.msk.bf16.mxu1 %vm71_vm0, %v40_v4  ;;  %v32_v15 = vld [vmem:[%s683_s0 + $0x40] sm:$0xff]  ;;  %v33_v16 = vld [vmem:[%s683_s0 + $0x48] sm:$0xff]  ;;  %v43_v17 = vpack.c.bf16 %v31_v14, %v30_v13  ;;  %v34_v19 = vld [vmem:[%s683_s0 + $0x50] sm:$0xff] }
   0x6   :  { %v44_v18 = vpack.c.bf16 %v33_v16, %v32_v15  ;;  %v35_v20 = vld [vmem:[%s683_s0 + $0x58] sm:$0xff]  ;;  %v36_v21 = vld [vmem:[%s683_s0 + $0x60] sm:$0xff]  ;;  %v37_v22 = vld [vmem:[%s683_s0 + $0x68] sm:$0xff] }
   0x7   :  { %485 = vmatpush3.bf16.msra.mxu1 %v545_v1  ;;  %v45_v23 = vpack.c.bf16 %v35_v20, %v34_v19  ;;  %v46_v24 = vpack.c.bf16 %v37_v22, %v36_v21  ;;  %v38_v25 = vld [vmem:[%s683_s0 + $0x70] sm:$0xff]  ;;  %v39_v26 = vld [vmem:[%s683_s0 + $0x78] sm:$0xff]  ;;  %v431_v28 = vld [vmem:[%s685_s2] ss:$0 sm:$0xff]  ;;  %v548_v21 = vmov 0.0  }
   0x8   :  { %502 = vmatprep.subr.bf16.mxu1 %v546_v11  ;;  %v47_v27 = vpack.c.bf16 %v39_v26, %v38_v25  ;;  %522 = vmatprep.subr.bf16.mxu0 %v548_v21  ;;  %v442_v22 = vld [vmem:[%s686_s4] ss:$0 sm:$0xff] }
   0x9   :  { %538 = vmatprep.mubr.msk.bf16.mxu0 %vm549_vm1, %v548_v21 }
   0xa   :  { %487 = vmatmul.mubr.msk.bf16.vlgmr.msra.gmra.mrb[0].mxu1 %vm71_vm0, %v41_v9 }
   0xb   :  { %490 = vmatprep.mubr.msk.bf16.mxu1 %vm71_vm0, %v42_v10  ;;  %503 = vmatpush3.bf16.msra.mxu1 %v546_v11 }
   0xc   :  { %504 = vmatprep.subr.bf16.mxu1 %v547_v12 }
   0xf   :  { %505 = vmatpush3.bf16.msra.mxu1 %v547_v12 }
  0x12   :  { %491 = vmatmul.mubr.msk.bf16.gmra.mrb[4].mxu1 %vm71_vm0, %v43_v17 }
  0x13   :  { %494 = vmatprep.mubr.msk.bf16.mxu1 %vm71_vm0, %v44_v18 }
  0x1a   :  { %495 = vmatmul.mubr.msk.bf16.gmra.mrb[8].mxu1 %vm71_vm0, %v45_v23 }
  0x1b   :  { %498 = vmatprep.mubr.msk.bf16.mxu1 %vm71_vm0, %v46_v24 }
  0x22   :  { %499 = vmatmul.mubr.msk.bf16.gmra.mrb[12].mxu1 %vm71_vm0, %v47_v27 }
  0xdd   :  { %v488_v29 = vpop.f32.mrb[0].mxu1 }
  0xde   :  { %v139_v30 = vadd.f32 %v488_v29, %v431_v28  ;;  %v130_v31 = vpop.f32.mrb[1].mxu1 }
  0xdf   :  { %v131_v32 = vadd.f32 %v431_v28, %v130_v31  ;;  %v489_v33 = vpop.f32.mrb[2].mxu1 }
  0xe0   :  { %v142_v34 = vadd.f32 %v489_v33, %v431_v28  ;;  %v133_v35 = vpop.f32.mrb[3].mxu1  ;;  %v195_v37 = vmax.f32 %v139_v30, 0.0 }
  0xe1   :  { %v134_v36 = vadd.f32 %v431_v28, %v133_v35  ;;  %v193_v39 = vmax.f32 %v131_v32, 0.0 }
  0xe2   :  { %v196_v38 = vmax.f32 %v142_v34, 0.0 }
  0xe3   :  { %v194_v40 = vmax.f32 %v134_v36, 0.0 }
  0xe4   :  { %v210_v41 = vpack.c.bf16 %v196_v38, %v195_v37 }
  0xe5   :  { %v209_v42 = vpack.c.bf16 %v194_v40, %v193_v39  ;;  %v492_v43 = vpop.f32.mrb[4].mxu1 }
  0xe6   :  { %v155_v44 = vadd.f32 %v492_v43, %v431_v28  ;;  %v146_v45 = vpop.f32.mrb[5].mxu1 }
  0xe7   :  { %v147_v46 = vadd.f32 %v431_v28, %v146_v45  ;;  %506 = vmatprep.mubr.msk.bf16.mxu1 %vm71_vm0, %v209_v42  ;;  %v493_v47 = vpop.f32.mrb[6].mxu1 }
  0xe8   :  { %v199_v48 = vmax.f32 %v155_v44, 0.0  ;;  %v158_v49 = vadd.f32 %v493_v47, %v431_v28  ;;  %507 = vmatmul.mubr.msk.bf16.vlgmr.msra.gmra.mrb[16].mxu1 %vm71_vm0, %v210_v41  ;;  %v149_v50 = vpop.f32.mrb[7].mxu1 }
  0xe9   :  { %v197_v51 = vmax.f32 %v147_v46, 0.0  ;;  %v150_v52 = vadd.f32 %v431_v28, %v149_v50 }
  0xea   :  { %v200_v53 = vmax.f32 %v158_v49, 0.0 }
  0xeb   :  { %v198_v54 = vmax.f32 %v150_v52, 0.0 }
  0xec   :  { %v212_v55 = vpack.c.bf16 %v200_v53, %v199_v48 }
  0xed   :  { %v211_v56 = vpack.c.bf16 %v198_v54, %v197_v51  ;;  %v496_v57 = vpop.f32.mrb[8].mxu1 }
  0xee   :  { %v171_v58 = vadd.f32 %v496_v57, %v431_v28  ;;  %v162_v59 = vpop.f32.mrb[9].mxu1 }
  0xef   :  { %510 = vmatprep.mubr.msk.bf16.mxu1 %vm71_vm0, %v211_v56  ;;  %v163_v60 = vadd.f32 %v431_v28, %v162_v59  ;;  %v497_v61 = vpop.f32.mrb[10].mxu1 }
  0xf0   :  { %511 = vmatmul.mubr.msk.bf16.gmra.mrb[20].mxu1 %vm71_vm0, %v212_v55  ;;  %v203_v62 = vmax.f32 %v171_v58, 0.0  ;;  %v174_v63 = vadd.f32 %v497_v61, %v431_v28  ;;  %v165_v0 = vpop.f32.mrb[11].mxu1 }
  0xf1   :  { %v201_v1 = vmax.f32 %v163_v60, 0.0  ;;  %v166_v2 = vadd.f32 %v431_v28, %v165_v0 }
  0xf2   :  { %v204_v3 = vmax.f32 %v174_v63, 0.0 }
  0xf3   :  { %v202_v4 = vmax.f32 %v166_v2, 0.0 }
  0xf4   :  { %v214_v5 = vpack.c.bf16 %v204_v3, %v203_v62 }
  0xf5   :  { %v213_v6 = vpack.c.bf16 %v202_v4, %v201_v1  ;;  %v500_v7 = vpop.f32.mrb[12].mxu1 }
  0xf6   :  { %v187_v8 = vadd.f32 %v500_v7, %v431_v28  ;;  %v178_v9 = vpop.f32.mrb[13].mxu1 }
  0xf7   :  { %514 = vmatprep.mubr.msk.bf16.mxu1 %vm71_vm0, %v213_v6  ;;  %v179_v10 = vadd.f32 %v431_v28, %v178_v9  ;;  %v501_v11 = vpop.f32.mrb[14].mxu1 }
  0xf8   :  { %515 = vmatmul.mubr.msk.bf16.gmra.mrb[24].mxu1 %vm71_vm0, %v214_v5  ;;  %v207_v12 = vmax.f32 %v187_v8, 0.0  ;;  %v190_v13 = vadd.f32 %v501_v11, %v431_v28  ;;  %v181_v14 = vpop.f32.mrb[15].mxu1 }
  0xf9   :  { %v205_v15 = vmax.f32 %v179_v10, 0.0  ;;  %v182_v16 = vadd.f32 %v431_v28, %v181_v14 }
  0xfa   :  { %v208_v17 = vmax.f32 %v190_v13, 0.0 }
  0xfb   :  { %v206_v18 = vmax.f32 %v182_v16, 0.0 }
  0xfc   :  { %v216_v19 = vpack.c.bf16 %v208_v17, %v207_v12 }
  0xfd   :  { %v215_v20 = vpack.c.bf16 %v206_v18, %v205_v15  ;;  %v385_v15 = vld [vmem:[%s687_s5] sm:$0x1] }
  0xff   :  { %518 = vmatprep.mubr.msk.bf16.mxu1 %vm71_vm0, %v215_v20 }
 0x100   :  { %519 = vmatmul.mubr.msk.bf16.gmra.mrb[28].mxu1 %vm71_vm0, %v216_v19 }
 0x1bb   :  { %v508_v23 = vpop.f32.mrb[16].mxu1 }
 0x1bc   :  { %v307_v24 = vadd.f32 %v508_v23, %v442_v22  ;;  %v298_v25 = vpop.f32.mrb[17].mxu1 }
 0x1bd   :  { %v299_v26 = vadd.f32 %v442_v22, %v298_v25  ;;  %v509_v27 = vpop.f32.mrb[18].mxu1 }
 0x1be   :  { %v310_v28 = vadd.f32 %v509_v27, %v442_v22  ;;  %v301_v29 = vpop.f32.mrb[19].mxu1  ;;  %v363_v31 = vmax.f32 %v307_v24, 0.0 }
 0x1bf   :  { %v302_v30 = vadd.f32 %v442_v22, %v301_v29  ;;  %v361_v33 = vmax.f32 %v299_v26, 0.0 }
 0x1c0   :  { %v364_v32 = vmax.f32 %v310_v28, 0.0 }
 0x1c1   :  { %v362_v34 = vmax.f32 %v302_v30, 0.0 }
 0x1c2   :  { %v378_v35 = vpack.c.bf16 %v364_v32, %v363_v31 }
 0x1c3   :  { %v512_v36 = vpop.f32.mrb[20].mxu1  ;;  %v377_v37 = vpack.c.bf16 %v362_v34, %v361_v33 }
 0x1c4   :  { %v323_v38 = vadd.f32 %v512_v36, %v442_v22  ;;  %v314_v39 = vpop.f32.mrb[21].mxu1 }
 0x1c5   :  { %v315_v40 = vadd.f32 %v442_v22, %v314_v39  ;;  %523 = vmatpush3.bf16.xpose.msra.mxu0 %v377_v37  ;;  %v513_v41 = vpop.f32.mrb[22].mxu1 }
 0x1c6   :  { %v367_v42 = vmax.f32 %v323_v38, 0.0  ;;  %v326_v43 = vadd.f32 %v513_v41, %v442_v22  ;;  %v317_v44 = vpop.f32.mrb[23].mxu1  ;;  %524 = vmatprep.subr.bf16.mxu0 %v548_v21 }
 0x1c7   :  { %v365_v45 = vmax.f32 %v315_v40, 0.0  ;;  %v318_v46 = vadd.f32 %v442_v22, %v317_v44 }
 0x1c8   :  { %v368_v47 = vmax.f32 %v326_v43, 0.0 }
 0x1c9   :  { %v366_v48 = vmax.f32 %v318_v46, 0.0 }
 0x1ca   :  { %v380_v49 = vpack.c.bf16 %v368_v47, %v367_v42 }
 0x1cb   :  { %v379_v50 = vpack.c.bf16 %v366_v48, %v365_v45  ;;  %v516_v51 = vpop.f32.mrb[24].mxu1 }
 0x1cc   :  { %v339_v52 = vadd.f32 %v516_v51, %v442_v22  ;;  %v330_v53 = vpop.f32.mrb[25].mxu1 }
 0x1cd   :  { %525 = vmatpush3.bf16.xpose.msra.mxu0 %v378_v35  ;;  %v331_v54 = vadd.f32 %v442_v22, %v330_v53  ;;  %v517_v55 = vpop.f32.mrb[26].mxu1 }
 0x1ce   :  { %v371_v56 = vmax.f32 %v339_v52, 0.0  ;;  %526 = vmatprep.subr.bf16.mxu0 %v548_v21  ;;  %v342_v57 = vadd.f32 %v517_v55, %v442_v22  ;;  %v333_v58 = vpop.f32.mrb[27].mxu1 }
 0x1cf   :  { %v369_v59 = vmax.f32 %v331_v54, 0.0  ;;  %v334_v60 = vadd.f32 %v442_v22, %v333_v58 }
 0x1d0   :  { %v372_v61 = vmax.f32 %v342_v57, 0.0 }
 0x1d1   :  { %v370_v62 = vmax.f32 %v334_v60, 0.0 }
 0x1d2   :  { %v382_v63 = vpack.c.bf16 %v372_v61, %v371_v56 }
 0x1d3   :  { %v381_v0 = vpack.c.bf16 %v370_v62, %v369_v59  ;;  %v520_v1 = vpop.f32.mrb[28].mxu1 }
 0x1d4   :  { %v355_v2 = vadd.f32 %v520_v1, %v442_v22  ;;  %v346_v3 = vpop.f32.mrb[29].mxu1 }
 0x1d5   :  { %527 = vmatpush3.bf16.xpose.msra.mxu0 %v379_v50  ;;  %v347_v4 = vadd.f32 %v442_v22, %v346_v3  ;;  %v521_v5 = vpop.f32.mrb[30].mxu1 }
 0x1d6   :  { %528 = vmatprep.subr.bf16.mxu0 %v548_v21  ;;  %v375_v6 = vmax.f32 %v355_v2, 0.0  ;;  %v358_v7 = vadd.f32 %v521_v5, %v442_v22  ;;  %v349_v8 = vpop.f32.mrb[31].mxu1 }
 0x1d7   :  { %v373_v9 = vmax.f32 %v347_v4, 0.0  ;;  %v350_v10 = vadd.f32 %v442_v22, %v349_v8 }
 0x1d8   :  { %v376_v11 = vmax.f32 %v358_v7, 0.0 }
 0x1d9   :  { %v374_v12 = vmax.f32 %v350_v10, 0.0 }
 0x1da   :  { %v384_v13 = vpack.c.bf16 %v376_v11, %v375_v6 }
 0x1db   :  { %v383_v14 = vpack.c.bf16 %v374_v12, %v373_v9 }
 0x1dd   :  { %529 = vmatpush3.bf16.xpose.msra.mxu0 %v380_v49 }
 0x1de   :  { %530 = vmatprep.subr.bf16.mxu0 %v548_v21 }
 0x1e5   :  { %531 = vmatpush3.bf16.xpose.msra.mxu0 %v381_v0 }
 0x1e6   :  { %532 = vmatprep.subr.bf16.mxu0 %v548_v21 }
 0x1ed   :  { %533 = vmatpush3.bf16.xpose.msra.mxu0 %v382_v63 }
 0x1ee   :  { %534 = vmatprep.subr.bf16.mxu0 %v548_v21 }
 0x1f5   :  { %535 = vmatpush3.bf16.xpose.msra.mxu0 %v383_v14 }
 0x1f6   :  { %536 = vmatprep.subr.bf16.mxu0 %v548_v21 }
 0x1fd   :  { %537 = vmatpush3.bf16.xpose.msra.mxu0 %v384_v13 }
 0x204   :  { %539 = vmatmul.mubr.bf16.vlgmr.msra.gmra.mrb[0].mxu0 %v385_v15 }
 0x2d7   :  { %v420_v16 = vpop.f32.mrb[0].mxu0 }
 0x2d8   :  { %426 = vst [vmem:[%s688_s6] sm:$0x1] %v420_v16  ;;  %v540_v17 = vpop.f32.mrb[1].mxu0 }
 0x2d9   :  { %v423_v18 = vpop.f32.mrb[2].mxu0 }
 0x2da   :  { %v541_v19 = vpop.f32.mrb[3].mxu0 }

</bundles_post_ra>
